<compile_context>
chip_gen: v7x
topology: tpu7x:2x2x1
jax: 0.10.0
libtpu: 0.0.40
codegen_flags: <defaults>
</compile_context>

<pallas_src>
import functools

import jax
import jax.numpy as jnp
from jax.experimental import pallas as pl
from jax.experimental.pallas import tpu as pltpu


# --------------------------- kernels -----------------------------------------

def _proj_kernel_single_k(x_ref, w_ref, b_ref, o_ref):
    """K fits one block: grid=(M_tiles,), no accumulator scratch needed."""
    o_ref[...] = (jnp.dot(x_ref[...], w_ref[...],
                          preferred_element_type=jnp.float32)
                  + b_ref[...]).astype(o_ref.dtype)


def _proj_kernel_tiled_k_resident_w(x_ref, w_ref, b_ref, o_ref, acc_ref, *, tk):
    """K is tiled; the full (Kp, E) weight stays resident in VMEM.

    Grid = (M_tiles, K_tiles); K (axis 1) is the reduction axis. The output
    block and acc_ref stay resident across it; the current K slab of the
    weight is sliced in-kernel so the weight is DMA'd from HBM exactly once.
    """
    k = pl.program_id(1)

    @pl.when(k == 0)
    def _init():
        acc_ref[...] = jnp.zeros_like(acc_ref)

    off = pl.multiple_of(k * tk, tk)
    acc_ref[...] += jnp.dot(x_ref[...], w_ref[pl.ds(off, tk), :],
                            preferred_element_type=jnp.float32)

    @pl.when(k == pl.num_programs(1) - 1)
    def _finalize():
        o_ref[...] = (acc_ref[...] + b_ref[...]).astype(o_ref.dtype)


def _proj_kernel_tiled_k_stream_w(x_ref, w_ref, b_ref, o_ref, acc_ref):
    """Fallback when the full weight is too large for VMEM residency: a
    (tk, E) weight slab is streamed per K step (re-fetched once per M tile)."""
    k = pl.program_id(1)

    @pl.when(k == 0)
    def _init():
        acc_ref[...] = jnp.zeros_like(acc_ref)

    acc_ref[...] += jnp.dot(x_ref[...], w_ref[...],
                            preferred_element_type=jnp.float32)

    @pl.when(k == pl.num_programs(1) - 1)
    def _finalize():
        o_ref[...] = (acc_ref[...] + b_ref[...]).astype(o_ref.dtype)


# --------------------------- helpers ------------------------------------------

def _round_up(x, m):
    return (x + m - 1) // m * m


def _sublane(dtype):
    # sublane granularity of the (8,128)/(16,128) tiling rule
    return 16 if jnp.dtype(dtype).itemsize < 4 else 8


def _vmem_budget_bytes():
    """~3/4 of physical VMEM: 48 MiB on v7x (64 MiB/TC), 96 MiB on v5e/v6e."""
    cap = 0
    try:
        cap = int(getattr(pltpu.get_tpu_info(), "vmem_capacity_bytes", 0))
    except Exception:
        cap = 0
    if cap <= 0:
        cap = 64 * 1024 * 1024          # conservative default = v7x per-TC VMEM
    return min(112 * 1024 * 1024, max(32 * 1024 * 1024, cap * 3 // 4))


# --------------------------- entry point --------------------------------------

@functools.partial(jax.jit, static_argnums=(3, 4, 5, 6, 7))
def _patch_embed_call(x, weight, bias, patch_size, compute_dtype,
                      block_m, block_k, force_weight_stream):
    ph, pw = patch_size
    B, C, H, W = x.shape
    E = weight.shape[0]
    Ph, Pw = H // ph, W // pw
    N = Ph * Pw
    M = B * N
    K = C * ph * pw

    out_dtype = x.dtype
    if compute_dtype is None:
        compute_dtype = x.dtype
    itm = jnp.dtype(compute_dtype).itemsize
    out_itm = jnp.dtype(out_dtype).itemsize

    # ---- patch extraction glue (fused into the pallas_call input via
    #      allow_input_fusion when possible). The .astype runs *before* the
    #      transpose so a materialized intermediate is already compute-dtype
    #      width. NCHW keeps pw as the lane dim through the permute; feature
    #      order (c, kh, kw) matches PyTorch's OIHW flatten, so only the small
    #      weight needs a one-off (E, K) -> (K, E) reorder.
    xc = x.astype(compute_dtype)
    xp = jnp.transpose(xc.reshape(B, C, Ph, ph, Pw, pw),
                       (0, 2, 4, 1, 3, 5)).reshape(M, K)
    wf = weight.reshape(E, K).T.astype(compute_dtype)
    bf = bias.reshape(1, E).astype(jnp.float32)

    # ---- lane-dense output: pad E to a multiple of 128 (sliced off after).
    Ep = _round_up(E, 128)
    if Ep > E:
        wf = jnp.pad(wf, ((0, 0), (0, Ep - E)))
        bf = jnp.pad(bf, ((0, 0), (0, Ep - E)))

    # ---- K tiling decision ----
    bk = block_k if block_k is not None else 2048
    if K > bk:
        tk = _round_up(bk, 256)        # 256-dense contraction (v6e/v7x MXU 2x256^2)
        Kp = _round_up(K, tk)
        k_tiled = True
    else:
        tk = Kp = K                    # single K block == full dim (always legal)
        k_tiled = False

    # ---- generation-aware VMEM budget + weight residency ----
    vmem_budget = _vmem_budget_bytes()
    w_bytes = Kp * Ep * itm
    w_resident = (k_tiled and not force_weight_stream
                  and 2 * w_bytes <= vmem_budget // 3)

    # ---- M tile: biggest tile whose (double-buffered) working set fits ----
    sub = max(_sublane(compute_dtype), _sublane(out_dtype))

    def vmem_bytes(tm_):
        x_k = tk if k_tiled else Kp
        b = 2 * tm_ * x_k * itm                 # double-buffered patch stream
        b += 2 * tm_ * Ep * out_itm             # double-buffered output
        b += 2 * Ep * 4                         # bias
        if k_tiled:
            b += tm_ * Ep * 4                   # f32 accumulator scratch
            b += 2 * w_bytes if w_resident else 2 * tk * Ep * itm
        else:
            b += 2 * w_bytes                    # resident weight
        return b

    if block_m is not None:
        tm = _round_up(min(block_m, _round_up(M, sub)), sub)
    else:
        tm = sub
        for cand in (2048, 1024, 512, 256, 128, 64, 32, 16, 8):
            c = _round_up(min(cand, _round_up(M, sub)), sub)
            if vmem_bytes(c) <= int(vmem_budget * 0.85):
                tm = c
                break
    Mp = _round_up(M, tm)

    # ---- zero-pad M (and K when tiled) so the grid divides evenly ----
    if Mp > M or Kp > K:
        xp = jnp.pad(xp, ((0, Mp - M), (0, Kp - K)))
    if Kp > K:
        wf = jnp.pad(wf, ((0, Kp - K), (0, 0)))

    m_tiles = Mp // tm
    w_stream_factor = 1 if (not k_tiled or w_resident) else m_tiles
    cost = pl.CostEstimate(
        flops=2 * Mp * Kp * Ep,
        transcendentals=0,
        bytes_accessed=(Mp * Kp * itm
                        + Kp * Ep * itm * w_stream_factor
                        + Ep * 4
                        + Mp * Ep * out_itm),
    )

    compiler_params = pltpu.CompilerParams(
        # M tiles are independent -> shard across v7x's 2 TensorCores; K (when
        # tiled) is the reduction (accumulator) axis.
        dimension_semantics=(("parallel", "arbitrary") if k_tiled
                             else ("parallel",)),
        vmem_limit_bytes=vmem_budget,
        # Allow XLA to fuse the patch-extraction transpose/pad/convert into the
        # pallas_call input instead of materializing it in HBM.
        allow_input_fusion=(True, False, False),
    )
    # TODO(synk): on v5e, pipeline_mode=pl.Buffered(3) on the patch stream would
    # hide exposed DMA latency further; the generation-aware larger tm already
    # consumes most of that headroom, so it is left as a tuning knob.

    if not k_tiled:
        out_flat = pl.pallas_call(
            _proj_kernel_single_k,
            out_shape=jax.ShapeDtypeStruct((Mp, Ep), out_dtype),
            grid_spec=pltpu.PrefetchScalarGridSpec(
                num_scalar_prefetch=0,
                grid=(m_tiles,),
                in_specs=[
                    pl.BlockSpec((tm, Kp), lambda i: (i, 0)),   # streamed patches
                    pl.BlockSpec((Kp, Ep), lambda i: (0, 0)),   # resident weight
                    pl.BlockSpec((1, Ep), lambda i: (0, 0)),    # resident bias
                ],
                out_specs=pl.BlockSpec((tm, Ep), lambda i: (i, 0)),
            ),
            compiler_params=compiler_params,
            cost_estimate=cost,
        )(xp, wf, bf)
    else:
        if w_resident:
            kernel = functools.partial(_proj_kernel_tiled_k_resident_w, tk=tk)
            w_spec = pl.BlockSpec((Kp, Ep), lambda i, k: (0, 0))   # resident, one DMA
        else:
            kernel = _proj_kernel_tiled_k_stream_w
            w_spec = pl.BlockSpec((tk, Ep), lambda i, k: (k, 0))   # streamed slabs
        out_flat = pl.pallas_call(
            kernel,
            out_shape=jax.ShapeDtypeStruct((Mp, Ep), out_dtype),
            grid_spec=pltpu.PrefetchScalarGridSpec(
                num_scalar_prefetch=0,
                grid=(m_tiles, Kp // tk),
                in_specs=[
                    pl.BlockSpec((tm, tk), lambda i, k: (i, k)),  # streamed patches
                    w_spec,
                    pl.BlockSpec((1, Ep), lambda i, k: (0, 0)),   # resident bias
                ],
                out_specs=pl.BlockSpec((tm, Ep), lambda i, k: (i, 0)),
                scratch_shapes=[pltpu.VMEM((tm, Ep), jnp.float32)],
            ),
            compiler_params=compiler_params,
            cost_estimate=cost,
        )(xp, wf, bf)

    return out_flat[:M, :E].reshape(B, N, E)


def patch_embed_forward(x, weight, bias, patch_size, *,
                        compute_dtype=jnp.bfloat16,
                        block_m=None, block_k=None,
                        _force_weight_stream=False):
    """PatchEmbed.forward.

    Args:
      x:      (B, C, H, W)    -- NCHW, like PyTorch.
      weight: (E, C, ph, pw)  -- Conv2d weight.
      bias:   (E,)            -- Conv2d bias.
      patch_size: (ph, pw)
      compute_dtype: MXU input dtype. Defaults to bf16 (kernel is HBM-bound;
        bf16 halves the dominant patch stream). Accumulation and the bias add
        are always f32 and the output keeps x.dtype; pass jnp.float32 (or None
        == x.dtype) for exact-f32 MXU inputs.
      block_m / block_k: optional tile-size overrides (for tuning / testing).
      _force_weight_stream: testing only -- force the streamed-weight K-tiled
        kernel even when the full weight would fit resident in VMEM.

    Returns:
      (out, (Ph, Pw)) with out of shape (B, Ph*Pw, E).
    """
    ph, pw = patch_size
    _, _, H, W = x.shape
    Ph, Pw = H // ph, W // pw
    out = _patch_embed_call(x, weight, bias, (ph, pw), compute_dtype,
                            block_m, block_k, bool(_force_weight_stream))
    # TODO(synk): norm_layer is None in the default config, so no norm is applied.
    return out, (Ph, Pw)


if __name__ == "__main__":
    key = jax.random.PRNGKey(0)

    def _reference(x, weight, bias, patch_size):
        ph, pw = patch_size
        B, C, H, W = x.shape
        E = weight.shape[0]
        Ph, Pw = H // ph, W // pw
        y = jax.lax.conv_general_dilated(
            x, weight, window_strides=(ph, pw), padding="VALID",
            dimension_numbers=("NCHW", "OIHW", "NCHW"),
        ) + bias.reshape(1, E, 1, 1)
        return jnp.transpose(y.reshape(B, E, Ph * Pw), (0, 2, 1))

    def _mk(key, B, C, H, W, ph, pw, E):
        k1, k2, k3, key = jax.random.split(key, 4)
        x = jax.random.normal(k1, (B, C, H, W), dtype=jnp.float32)
        w = jax.random.normal(k2, (E, C, ph, pw), dtype=jnp.float32) * 0.02
        b = jax.random.normal(k3, (E,), dtype=jnp.float32) * 0.02
        return x, w, b, key

    # ---- Test 1: module-consistent small config, exact f32 MXU inputs.
    #      E=32 exercises the lane-dense E -> 128 padding path.
    B, C, H, W, ph, pw, E = 2, 4, 16, 16, 4, 4, 32
    x, w, b, key = _mk(key, B, C, H, W, ph, pw, E)
    out, (Ph, Pw) = patch_embed_forward(x, w, b, (ph, pw),
                                        compute_dtype=jnp.float32)
    out = jax.block_until_ready(out)
    ref = _reference(x, w, b, (ph, pw))
    assert out.shape == (B, Ph * Pw, E) and (Ph, Pw) == (4, 4)
    assert jnp.allclose(out, ref, atol=1e-4, rtol=1e-4), "f32 mismatch"

    # ---- Test 2: default bf16 MXU inputs (f32 accumulation), same shapes.
    out, _ = patch_embed_forward(x, w, b, (ph, pw))
    out = jax.block_until_ready(out)
    assert jnp.allclose(out, ref, atol=3e-2, rtol=3e-2), "bf16 mismatch"

    # ---- Test 3: K-tiled path with resident weight (K=768, tk=256, 3 K steps)
    #      plus M padding (M=18 -> 24); f32 MXU inputs for a tight check.
    B, C, H, W, ph, pw, E = 2, 3, 48, 48, 16, 16, 128
    x, w, b, key = _mk(key, B, C, H, W, ph, pw, E)
    out, (Ph, Pw) = patch_embed_forward(x, w, b, (ph, pw),
                                        compute_dtype=jnp.float32, block_k=256)
    out = jax.block_until_ready(out)
    ref = _reference(x, w, b, (ph, pw))
    assert out.shape == (B, Ph * Pw, E)
    assert jnp.allclose(out, ref, atol=1e-3, rtol=1e-3), "K-tiled resident-W mismatch"

    # ---- Test 4: K-tiled fallback with streamed weight slabs.
    out, _ = patch_embed_forward(x, w, b, (ph, pw), compute_dtype=jnp.float32,
                                 block_k=256, _force_weight_stream=True)
    out = jax.block_until_ready(out)
    assert jnp.allclose(out, ref, atol=1e-3, rtol=1e-3), "K-tiled streamed-W mismatch"

    print("KERNEL_OK")
</pallas_src>

<mosaic_0001>
module attributes {stable_mosaic.version = 11 : i64} {
  func.func @_proj_kernel_single_k(%arg0: i32, %arg1: memref<32x64xf32, #tpu.memory_space<vmem>>, %arg2: memref<64x128xf32, #tpu.memory_space<vmem>>, %arg3: memref<1x128xf32, #tpu.memory_space<vmem>>, %arg4: memref<32x128xf32, #tpu.memory_space<vmem>>) attributes {dimension_semantics = [#tpu.dimension_semantics<parallel>], iteration_bounds = array<i64: 1>, scalar_prefetch = 0 : i64, scratch_operands = 0 : i64, tpu.core_type = #tpu.core_type<tc>, window_params = [{transform_indices = @transform_0, window_bounds = array<i64: 32, 64>}, {pipeline_mode = #tpu.pipeline_mode<synchronous>, transform_indices = @transform_1, window_bounds = array<i64: 64, 128>}, {pipeline_mode = #tpu.pipeline_mode<synchronous>, transform_indices = @transform_2, window_bounds = array<i64: 1, 128>}, {transform_indices = @transform_3, window_bounds = array<i64: 32, 128>}]} {
    %c0 = arith.constant 0 : index
    %c0_0 = arith.constant 0 : index
    %0 = vector.load %arg1[%c0, %c0_0] : memref<32x64xf32, #tpu.memory_space<vmem>>, vector<32x64xf32>
    %c0_1 = arith.constant 0 : index
    %c0_2 = arith.constant 0 : index
    %1 = vector.load %arg2[%c0_1, %c0_2] : memref<64x128xf32, #tpu.memory_space<vmem>>, vector<64x128xf32>
    %cst = arith.constant dense<0.000000e+00> : vector<32x128xf32>
    %2 = tpu.matmul %0, %1, %cst {dimension_numbers = #tpu.dot_dimension_numbers<[1], [0], [0], [1], [0, 0, 1, 1], [], []>} : vector<32x64xf32>, vector<64x128xf32>, vector<32x128xf32> -> vector<32x128xf32>
    %c0_3 = arith.constant 0 : index
    %c0_4 = arith.constant 0 : index
    %3 = vector.load %arg3[%c0_3, %c0_4] : memref<1x128xf32, #tpu.memory_space<vmem>>, vector<1x128xf32>
    %4 = vector.broadcast %3 : vector<1x128xf32> to vector<32x128xf32>
    %5 = arith.addf %2, %4 : vector<32x128xf32>
    %c0_5 = arith.constant 0 : index
    %c0_6 = arith.constant 0 : index
    %6 = vector.load %arg4[%c0_5, %c0_6] : memref<32x128xf32, #tpu.memory_space<vmem>>, vector<32x128xf32>
    tpu.vector_store %arg4[%c0_5, %c0_6], %5 {strides = array<i32>} : memref<32x128xf32, #tpu.memory_space<vmem>>, vector<32x128xf32>,
    return
  }
  func.func @transform_0(%arg0: i32) -> (i32, i32) {
    %c0_i32 = arith.constant 0 : i32
    %c0_i32_0 = arith.constant 0 : i32
    return %arg0, %c0_i32 : i32, i32
  }
  func.func @transform_1(%arg0: i32) -> (i32, i32) {
    %c0_i32 = arith.constant 0 : i32
    %c0_i32_0 = arith.constant 0 : i32
    %c0_i32_1 = arith.constant 0 : i32
    return %c0_i32, %c0_i32_0 : i32, i32
  }
  func.func @transform_2(%arg0: i32) -> (i32, i32) {
    %c0_i32 = arith.constant 0 : i32
    %c0_i32_0 = arith.constant 0 : i32
    %c0_i32_1 = arith.constant 0 : i32
    return %c0_i32, %c0_i32_0 : i32, i32
  }
  func.func @transform_3(%arg0: i32) -> (i32, i32) {
    %c0_i32 = arith.constant 0 : i32
    %c0_i32_0 = arith.constant 0 : i32
    return %arg0, %c0_i32 : i32, i32
  }
}

</mosaic_0001>

<bundles_post_ra>
// kernel: _patch_embed_call.1
= control target key start
LH: loop header
LB: loop body
LE: loop exit
PB: predicated region body
PF: predicated region fallthrough
CT: control target
= control target key end

     0   :  { %vm34_vm0 = vcmask 523264   ;;  %s320_s0 = inlined_call_operand.vmem [shape: f32[32,64], index: 0, kind: input, shape index: {}]   ;;  %s321_s1 = inlined_call_operand.vmem [shape: f32[64,128], index: 1, kind: input, shape index: {}]   ;;  %s322_s2 = inlined_call_operand.vmem [shape: f32[1,128], index: 2, kind: input, shape index: {}]   ;;  %s323_s3 = inlined_call_operand.hbm [shape: f32[32,128], index: 3, kind: output, shape index: {}]  }
   0x1   :  { %v19_v0 = vld [vmem:[%s321_s1] sm:$0xff]  ;;  %v20_v1 = vld [vmem:[%s321_s1 + $0x8] sm:$0xff]  ;;  %v21_v2 = vld [vmem:[%s321_s1 + $0x10] sm:$0xff] }
   0x2   :  { %v191_v3 = vpack.c.bf16 %v20_v1, %v19_v0  ;;  %v22_v4 = vld [vmem:[%s321_s1 + $0x18] sm:$0xff]  ;;  %v23_v6 = vld [vmem:[%s321_s1 + $0x20] sm:$0xff]  ;;  %v24_v7 = vld [vmem:[%s321_s1 + $0x28] sm:$0xff] }
   0x3   :  { %v195_v5 = vpack.c.bf16 %v22_v4, %v21_v2  ;;  %v15_v8 = vld [vmem:[%s320_s0] sm:$0xff]  ;;  %v17_v9 = vld [vmem:[%s320_s0 + $0x10] sm:$0xff] }
   0x4   :  { %192 = vmatprep.subr.bf16.mxu0 %v191_v3  ;;  %207 = vmatprep.subr.bf16.mxu1 %v191_v3 }
   0x5   :  { %194 = vmatpush3.bf16.msra.mxu0 %v191_v3  ;;  %211 = vmatpush3.bf16.msra.mxu1 %v191_v3 }
   0x6   :  { %8 = vsyncpa [#allocation3], 0  ;;  %196 = vmatprep.subr.bf16.mxu0 %v195_v5  ;;  %208 = vmatprep.subr.bf16.mxu1 %v195_v5  ;;  %v199_v10 = vpack.c.bf16 %v24_v7, %v23_v6  ;;  %v25_v11 = vld [vmem:[%s321_s1 + $0x30] sm:$0xff]  ;;  %v26_v12 = vld [vmem:[%s321_s1 + $0x38] sm:$0xff]  ;;  %s242_s10 = smov [#allocation2]  }
   0x7   :  { %185 = vmatprep.mubr.msk.f32.mxu0 %vm34_vm0, %v15_v8  ;;  %188 = vmatprep.mubr.msk.f32.mxu1 %vm34_vm0, %v17_v9  ;;  %v203_v13 = vpack.c.bf16 %v26_v12, %v25_v11  ;;  %v16_v14 = vld [vmem:[%s320_s0 + $0x8] sm:$0xff]  ;;  %v18_v15 = vld [vmem:[%s320_s0 + $0x18] sm:$0xff]  ;;  %v152_v16 = vld [vmem:[%s322_s2] ss:$0 sm:$0xff]  ;;  %s141_s11 = sshll.u32 %s242_s10, 4  ;;  %s142_s11 = int_to_ptr.vmem [resolvable:$true] %s141_s11 }
   0x8   :  { %s218_s0 = scalar_lea.vmem %s142_s11, 512  ;;  %p223_p1 = scmp.lt.s32.totalorder %s142_s11, %s142_s11 }
   0x9   :  { %198 = vmatpush3.bf16.msra.mxu0 %v195_v5  ;;  %212 = vmatpush3.bf16.msra.mxu1 %v195_v5  ;;  %p219_p0 = scmp.ne.s32.totalorder %s142_s11, %s218_s0  ;;  %p224_p2 = scmp.lt.s32.totalorder %s218_s0, %s218_s0 }
   0xa   :  { %200 = vmatprep.subr.bf16.mxu0 %v199_v10  ;;  %209 = vmatprep.subr.bf16.mxu1 %v199_v10 }
   0xb   :  { %p225_p3 = por %p224_p2, %p223_p1 }
   0xd   :  { %202 = vmatpush3.bf16.msra.mxu0 %v199_v10  ;;  %213 = vmatpush3.bf16.msra.mxu1 %v199_v10  ;;  %p226_p4 = pnand %p225_p3, %p219_p0 }
   0xe   :  { %204 = vmatprep.subr.bf16.mxu0 %v203_v13  ;;  %210 = vmatprep.subr.bf16.mxu1 %v203_v13 }
  0x11   :  { %206 = vmatpush3.bf16.msra.mxu0 %v203_v13  ;;  %214 = vmatpush3.bf16.msra.mxu1 %v203_v13 }
  0x14   :  { %186 = vmatmul.mubr.msk.f32.vlgmr.msra.gmra.mrb[0].mxu0 %vm34_vm0, %v16_v14  ;;  %189 = vmatmul.mubr.msk.f32.vlgmr.msra.gmra.mrb[0].mxu1 %vm34_vm0, %v18_v15 }
  0xe7   :  { %v187_v17 = vpop.f32.mrb[0].mxu0  ;;  %v190_v18 = vpop.f32.mrb[0].mxu1 }
  0xe8   :  { %v119_v19 = vadd.f32 %v187_v17, %v152_v16  ;;  %v129_v20 = vadd.f32 %v190_v18, %v152_v16  ;;  %v113_v21 = vpop.f32.mrb[1].mxu0  ;;  %v123_v22 = vpop.f32.mrb[1].mxu1 }
  0xe9   :  { %v114_v23 = vadd.f32 %v152_v16, %v113_v21  ;;  %v124_v24 = vadd.f32 %v152_v16, %v123_v22 }
  0xea   :  { %133 = vst [vmem:[#allocation2 + $0x8] sm:$0xff] %v119_v19  ;;  %135 = vst [vmem:[#allocation2 + $0x18] sm:$0xff] %v129_v20 }
  0xeb   :  { %132 = vst [vmem:[#allocation2] sm:$0xff] %v114_v23  ;;  %134 = vst [vmem:[#allocation2 + $0x10] sm:$0xff] %v124_v24 }
  0xec   :  { %229 = shalt.err (!%p226_p4)
}
  0xed   :  { %s230_s13 = scalar_lea.hbm %s323_s3, 512 }
  0xee   :  { %p231_p5 = scmp.ne.s32.totalorder %s323_s3, %s230_s13  ;;  %p234_p6 = scmp.lt.u32.totalorder %s230_s13, %s323_s3 }
  0xf0   :  { %p236_p7 = pnand %p234_p6, %p231_p5 }
  0xf2   :  { %239 = shalt.err (!%p236_p7)
}
  0xf3   :  { %s243_s18 = smov 128   ;;  %s244_s19 = smov 8  }
  0xf4   :  { %147 = dma.vmem_to_hbm [thread:$0]  %s142_s11, 512, %s323_s3, [#allocation3], %s243_s18, %s243_s18, %s244_s19  }
  0xf5   :  { %240 = dma.done.wait [#allocation3], 512  }
  0xf6   :  { %241 = vsyncadd [#allocation3], 4294966784 }
  0xf7   :  { %151 = vsyncpa [#allocation3], 1 }

</bundles_post_ra>
